<compile_context>
chip_gen: v6e
topology: v6e:2x2x1
jax: 0.10.0
libtpu: 0.0.40
codegen_flags: <defaults>
</compile_context>

<pallas_src>
import functools

import jax
import jax.numpy as jnp
from jax.experimental import pallas as pl
from jax.experimental.pallas import tpu as pltpu


_VMEM_LIMIT = 48 * 1024 * 1024        # explicit scoped-VMEM cap (safe on v5e/v6e/v7x)
_FUSED_VMEM_BUDGET = 40 * 1024 * 1024  # threshold for the single fused kernel
_H_RESIDENT_BUDGET = 16 * 1024 * 1024  # threshold for keeping h fully in VMEM


# ---------------------------------------------------------------------------
# Fused single-shot kernel (small N): everything resident in VMEM.
# ---------------------------------------------------------------------------

def _fused_propagate_kernel(adj_ref, x_ref, out_ref, h_scr, s_scr, *, layers):
    """All layers of h = adj @ h plus the (layers+1)-mean, fully in VMEM.

    adj_ref: [N, N] (bf16 or f32) streamed from HBM once.
    x_ref:   [N, D] f32.
    out_ref: [N, D] f32.
    h_scr/s_scr: [N, D] f32 VMEM scratch (current h / running sum).
    """
    x = x_ref[...].astype(jnp.float32)
    h_scr[...] = x
    if layers > 1:
        s_scr[...] = x

    # `layers` is static and small -> unrolled Python loop; state lives in refs.
    for _ in range(layers):
        a = adj_ref[...].astype(jnp.float32)   # bf16 stream -> f32 compute
        h_new = jnp.dot(a, h_scr[...], preferred_element_type=jnp.float32)
        h_scr[...] = h_new
        if layers > 1:
            s_scr[...] = s_scr[...] + h_new

    if layers > 1:
        out_ref[...] = (s_scr[...] * (1.0 / (layers + 1))).astype(out_ref.dtype)
    else:
        out_ref[...] = h_scr[...].astype(out_ref.dtype)


def _fused_forward(x32, adj_s, layers):
    N, D = x32.shape
    return pl.pallas_call(
        functools.partial(_fused_propagate_kernel, layers=layers),
        out_shape=jax.ShapeDtypeStruct((N, D), jnp.float32),
        grid_spec=pltpu.PrefetchScalarGridSpec(
            num_scalar_prefetch=0,
            grid=(1,),
            in_specs=[
                pl.BlockSpec((N, N), lambda i: (0, 0)),   # adj (full, bf16/f32)
                pl.BlockSpec((N, D), lambda i: (0, 0)),   # x   (full, f32)
            ],
            out_specs=pl.BlockSpec((N, D), lambda i: (0, 0)),
            scratch_shapes=[
                pltpu.VMEM((N, D), jnp.float32),   # h
                pltpu.VMEM((N, D), jnp.float32),   # running sum
            ],
        ),
        compiler_params=pltpu.CompilerParams(
            dimension_semantics=("arbitrary",),
            vmem_limit_bytes=_VMEM_LIMIT,
        ),
    )(adj_s, x32)


# ---------------------------------------------------------------------------
# Tiled per-layer kernel (large N): adj streamed in tiles, h resident if it
# fits, f32 accumulation directly into the output block, running sum fused.
# ---------------------------------------------------------------------------

def _tiled_spmm_kernel(*refs, tk, h_resident, with_sum):
    if with_sum:
        adj_ref, h_ref, s_ref, out_ref, s_out_ref = refs
    else:
        adj_ref, h_ref, out_ref = refs
        s_ref = s_out_ref = None

    k = pl.program_id(1)

    @pl.when(k == 0)
    def _():
        out_ref[...] = jnp.zeros_like(out_ref)

    a = adj_ref[...].astype(jnp.float32)      # bf16 stream -> f32 compute
    if h_resident:
        start = pl.multiple_of(k * tk, tk)
        hk = h_ref[pl.ds(start, tk), :]       # slice the VMEM-resident h
    else:
        hk = h_ref[...]                       # streamed (tk, D) block

    # Output block index is (i, 0) (independent of k) -> resident across the
    # reduction axis: accumulate straight into out_ref, no extra scratch.
    out_ref[...] += jnp.dot(a, hk, preferred_element_type=jnp.float32)

    if with_sum:
        @pl.when(k == pl.num_programs(1) - 1)
        def _():
            s_out_ref[...] = s_ref[...] + out_ref[...]


def _tiled_layer(adj_s, h, s, *, tm, tk, h_resident, with_sum):
    N, D = h.shape
    grid = (N // tm, N // tk)

    in_specs = [pl.BlockSpec((tm, tk), lambda i, k: (i, k))]   # adj tile
    if h_resident:
        # h loaded into VMEM once per layer (constant block index).
        in_specs.append(pl.BlockSpec((N, D), lambda i, k: (0, 0)))
    else:
        in_specs.append(pl.BlockSpec((tk, D), lambda i, k: (k, 0)))

    out_block = pl.BlockSpec((tm, D), lambda i, k: (i, 0))

    if with_sum:
        in_specs.append(pl.BlockSpec((tm, D), lambda i, k: (i, 0)))  # sum in
        out_specs = (out_block, pl.BlockSpec((tm, D), lambda i, k: (i, 0)))
        out_shape = (jax.ShapeDtypeStruct((N, D), jnp.float32),
                     jax.ShapeDtypeStruct((N, D), jnp.float32))
        args = (adj_s, h, s)
    else:
        out_specs = out_block
        out_shape = jax.ShapeDtypeStruct((N, D), jnp.float32)
        args = (adj_s, h)

    result = pl.pallas_call(
        functools.partial(_tiled_spmm_kernel, tk=tk,
                          h_resident=h_resident, with_sum=with_sum),
        out_shape=out_shape,
        grid_spec=pltpu.PrefetchScalarGridSpec(
            num_scalar_prefetch=0,
            grid=grid,
            in_specs=in_specs,
            out_specs=out_specs,
        ),
        compiler_params=pltpu.CompilerParams(
            dimension_semantics=("parallel", "arbitrary"),
            vmem_limit_bytes=_VMEM_LIMIT,
        ),
    )(*args)

    if with_sum:
        return result        # (h_new, s_new)
    return result, s


# ---------------------------------------------------------------------------
# Public wrapper (single jit over the whole forward)
# ---------------------------------------------------------------------------

@functools.partial(
    jax.jit,
    static_argnames=("layers", "feat_drop", "adj_dtype", "tm", "tk",
                     "force_tiled", "h_resident"))
def global_item_conv(x, adj, *, layers=1, feat_drop=0.0,
                     adj_dtype=jnp.bfloat16, tm=256, tk=512,
                     force_tiled=False, h_resident=None):
    """JAX/Pallas equivalent of GlobalItemConv.forward(x, adj)."""
    # TODO(synk): feat_drop > 0 (training-time dropout) is not implemented;
    # the module default feat_drop=0.0 is an identity.
    del feat_drop
    N, D = x.shape
    assert adj.shape == (N, N)

    x32 = x.astype(jnp.float32)
    adj_s = adj.astype(adj_dtype)       # pre-cast once; reused by every layer

    itemsize = jnp.dtype(adj_dtype).itemsize
    fused_vmem = (2 * N * N * itemsize   # adj stream (double-buffered)
                  + N * N * 4            # in-kernel f32 view of adj
                  + 8 * N * D * 4)       # x, out, h/sum scratch, temporaries
    use_fused = (not force_tiled) and fused_vmem <= _FUSED_VMEM_BUDGET

    if use_fused:
        return _fused_forward(x32, adj_s, layers).astype(x.dtype)

    # ----- tiled per-layer path -----
    tm_ = min(tm, N)
    while tm_ > 1 and N % tm_:
        tm_ //= 2
    # keep >= 2 row tiles so the 'parallel' axis can split across v7x's 2 TCs
    if N // tm_ < 2 and tm_ % 2 == 0 and tm_ >= 16:
        tm_ //= 2
    tk_ = min(tk, N)
    while tk_ > 1 and N % tk_:
        tk_ //= 2
    assert N % tm_ == 0 and N % tk_ == 0

    if h_resident is None:
        h_resident = (N * D * 4) <= _H_RESIDENT_BUDGET

    with_sum = layers > 1
    h = x32
    s = x32
    for _ in range(layers):
        h, s = _tiled_layer(adj_s, h, s, tm=tm_, tk=tk_,
                            h_resident=h_resident, with_sum=with_sum)
    if layers > 1:
        h = s * (1.0 / (layers + 1))
    return h.astype(x.dtype)


# ---------------------------------------------------------------------------
# Reference (plain JAX, f32) for sanity checking
# ---------------------------------------------------------------------------

def _reference(x, adj, layers):
    h = x.astype(jnp.float32)
    final = [h]
    adj32 = adj.astype(jnp.float32)
    for _ in range(layers):
        h = adj32 @ h
        final.append(h)
    if layers > 1:
        h = jnp.sum(jnp.stack(final), axis=0) / (layers + 1)
    return h.astype(x.dtype)


# ---------------------------------------------------------------------------
# Main
# ---------------------------------------------------------------------------

if __name__ == "__main__":
    key = jax.random.PRNGKey(0)
    k_x, k_adj, k_mask = jax.random.split(key, 3)

    N, D = 256, 128  # N graph nodes, D-dim item features
    x = jax.random.normal(k_x, (N, D), dtype=jnp.float32)

    # Deterministic sparse-ish, row-normalized adjacency (stored dense).
    raw = jax.random.uniform(k_adj, (N, N), dtype=jnp.float32)
    mask = (jax.random.uniform(k_mask, (N, N)) < 0.05).astype(jnp.float32)
    adj = raw * mask
    adj = adj / jnp.maximum(adj.sum(axis=1, keepdims=True), 1e-6)

    # Reference for the bf16-streamed-adj config: same adj rounding, f32 math.
    adj_bf = adj.astype(jnp.bfloat16).astype(jnp.float32)

    for layers in (1, 2):
        ref_f32 = _reference(x, adj, layers)
        ref_bf = _reference(x, adj_bf, layers)

        # Bit-accurate validation (adj kept f32): fused and tiled paths.
        out = jax.block_until_ready(
            global_item_conv(x, adj, layers=layers, adj_dtype=jnp.float32))
        assert out.shape == (N, D) and out.dtype == x.dtype
        assert jnp.allclose(out, ref_f32, atol=1e-4, rtol=1e-4)

        out_t = jax.block_until_ready(
            global_item_conv(x, adj, layers=layers, adj_dtype=jnp.float32,
                             force_tiled=True))
        assert jnp.allclose(out_t, ref_f32, atol=1e-4, rtol=1e-4)

        # Default perf config: adj streamed as bf16, f32 accumulation (fused).
        out_bf = jax.block_until_ready(
            global_item_conv(x, adj, layers=layers))
        assert jnp.allclose(out_bf, ref_bf, atol=1e-4, rtol=1e-4)

        # Tiled path with bf16 adj and VMEM-resident h.
        out_bf_t = jax.block_until_ready(
            global_item_conv(x, adj, layers=layers, force_tiled=True))
        assert jnp.allclose(out_bf_t, ref_bf, atol=1e-4, rtol=1e-4)

        # Tiled path with streamed h (the very-large-N fallback).
        out_bf_s = jax.block_until_ready(
            global_item_conv(x, adj, layers=layers, force_tiled=True,
                             h_resident=False))
        assert jnp.allclose(out_bf_s, ref_bf, atol=1e-4, rtol=1e-4)

    print("KERNEL_OK")
</pallas_src>

<mosaic_0001>
module attributes {stable_mosaic.version = 11 : i64} {
  func.func @_fused_propagate_kernel(%arg0: i32, %arg1: memref<256x256xf32, #tpu.memory_space<vmem>>, %arg2: memref<256x128xf32, #tpu.memory_space<vmem>>, %arg3: memref<256x128xf32, #tpu.memory_space<vmem>>, %arg4: memref<256x128xf32, #tpu.memory_space<vmem>>, %arg5: memref<256x128xf32, #tpu.memory_space<vmem>>) attributes {dimension_semantics = [#tpu.dimension_semantics<arbitrary>], iteration_bounds = array<i64: 1>, scalar_prefetch = 0 : i64, scratch_operands = 2 : i64, tpu.core_type = #tpu.core_type<tc>, window_params = [{pipeline_mode = #tpu.pipeline_mode<synchronous>, transform_indices = @transform_0, window_bounds = array<i64: 256, 256>}, {pipeline_mode = #tpu.pipeline_mode<synchronous>, transform_indices = @transform_1, window_bounds = array<i64: 256, 128>}, {pipeline_mode = #tpu.pipeline_mode<synchronous>, transform_indices = @transform_2, window_bounds = array<i64: 256, 128>}]} {
    %c0 = arith.constant 0 : index
    %c0_0 = arith.constant 0 : index
    %0 = vector.load %arg2[%c0, %c0_0] : memref<256x128xf32, #tpu.memory_space<vmem>>, vector<256x128xf32>
    %c0_1 = arith.constant 0 : index
    %c0_2 = arith.constant 0 : index
    %1 = vector.load %arg4[%c0_1, %c0_2] : memref<256x128xf32, #tpu.memory_space<vmem>>, vector<256x128xf32>
    tpu.vector_store %arg4[%c0_1, %c0_2], %0 {strides = array<i32>} : memref<256x128xf32, #tpu.memory_space<vmem>>, vector<256x128xf32>,
    %c0_3 = arith.constant 0 : index
    %c0_4 = arith.constant 0 : index
    %2 = vector.load %arg1[%c0_3, %c0_4] : memref<256x256xf32, #tpu.memory_space<vmem>>, vector<256x256xf32>
    %c0_5 = arith.constant 0 : index
    %c0_6 = arith.constant 0 : index
    %3 = vector.load %arg4[%c0_5, %c0_6] : memref<256x128xf32, #tpu.memory_space<vmem>>, vector<256x128xf32>
    %cst = arith.constant dense<0.000000e+00> : vector<256x128xf32>
    %4 = tpu.matmul %2, %3, %cst {dimension_numbers = #tpu.dot_dimension_numbers<[1], [0], [0], [1], [0, 0, 1, 1], [], []>} : vector<256x256xf32>, vector<256x128xf32>, vector<256x128xf32> -> vector<256x128xf32>
    %c0_7 = arith.constant 0 : index
    %c0_8 = arith.constant 0 : index
    %5 = vector.load %arg4[%c0_7, %c0_8] : memref<256x128xf32, #tpu.memory_space<vmem>>, vector<256x128xf32>
    tpu.vector_store %arg4[%c0_7, %c0_8], %4 {strides = array<i32>} : memref<256x128xf32, #tpu.memory_space<vmem>>, vector<256x128xf32>,
    %c0_9 = arith.constant 0 : index
    %c0_10 = arith.constant 0 : index
    %6 = vector.load %arg4[%c0_9, %c0_10] : memref<256x128xf32, #tpu.memory_space<vmem>>, vector<256x128xf32>
    %c0_11 = arith.constant 0 : index
    %c0_12 = arith.constant 0 : index
    %7 = vector.load %arg3[%c0_11, %c0_12] : memref<256x128xf32, #tpu.memory_space<vmem>>, vector<256x128xf32>
    tpu.vector_store %arg3[%c0_11, %c0_12], %6 {strides = array<i32>} : memref<256x128xf32, #tpu.memory_space<vmem>>, vector<256x128xf32>,
    return
  }
  func.func @transform_0(%arg0: i32) -> (i32, i32) {
    %c0_i32 = arith.constant 0 : i32
    %c0_i32_0 = arith.constant 0 : i32
    %c0_i32_1 = arith.constant 0 : i32
    return %c0_i32, %c0_i32_0 : i32, i32
  }
  func.func @transform_1(%arg0: i32) -> (i32, i32) {
    %c0_i32 = arith.constant 0 : i32
    %c0_i32_0 = arith.constant 0 : i32
    %c0_i32_1 = arith.constant 0 : i32
    return %c0_i32, %c0_i32_0 : i32, i32
  }
  func.func @transform_2(%arg0: i32) -> (i32, i32) {
    %c0_i32 = arith.constant 0 : i32
    %c0_i32_0 = arith.constant 0 : i32
    %c0_i32_1 = arith.constant 0 : i32
    return %c0_i32, %c0_i32_0 : i32, i32
  }
}

</mosaic_0001>

<bundles_post_ra>
// kernel: global_item_conv.1
= control target key start
LH: loop header
LB: loop body
LE: loop exit
PB: predicated region body
PF: predicated region fallthrough
CT: control target
= control target key end

     0   :  { %7 = vsyncpa [#allocation5], 0  ;;  %s779_s0 = inlined_call_operand.hbm [shape: f32[256,256], index: 0, kind: input, shape index: {}]   ;;  %s780_s1 = inlined_call_operand.hbm [shape: f32[256,128], index: 1, kind: input, shape index: {}]   ;;  %s781_s2 = inlined_call_operand.hbm [shape: f32[256,128], index: 2, kind: output, shape index: {}]  }
   0x1   :  { %8 = vsyncpa [#allocation8], 0 }
   0x2   :  { %9 = vsyncpa [#allocation6], 0  ;;  %s677_s9 = smov [#allocation4]  }
   0x3   :  { %s15_s10 = sshll.u32 %s677_s9, 4  ;;  %s16_s10 = int_to_ptr.vmem [resolvable:$true] %s15_s10 }
   0x4   :  { %s619_s11 = scalar_lea.vmem %s16_s10, 8192  ;;  %p624_p1 = scmp.lt.s32.totalorder %s16_s10, %s16_s10 }
   0x5   :  { %p620_p0 = scmp.ne.s32.totalorder %s16_s10, %s619_s11  ;;  %p625_p2 = scmp.lt.s32.totalorder %s619_s11, %s619_s11 }
   0x7   :  { %p626_p3 = por %p625_p2, %p624_p1 }
   0x9   :  { %p627_p4 = pnand %p626_p3, %p620_p0 }
   0xb   :  { %630 = shalt.err (!%p627_p4)
}
   0xc   :  { %s678_s12 = smov 256   ;;  %s679_s13 = smov 16  }
   0xd   :  { %21 = dma.hbm_to_vmem [thread:$0]  %s779_s0, 8192, %s16_s10, [#allocation5], %s678_s12, %s678_s12, %s679_s13  }
   0xe   :  { %s680_s16 = smov [#allocation7]  }
   0xf   :  { %s27_s17 = sshll.u32 %s680_s16, 4  ;;  %s28_s17 = int_to_ptr.vmem [resolvable:$true] %s27_s17 }
  0x10   :  { %s639_s18 = scalar_lea.vmem %s28_s17, 4096  ;;  %p644_p6 = scmp.lt.s32.totalorder %s28_s17, %s28_s17 }
  0x11   :  { %p640_p5 = scmp.ne.s32.totalorder %s28_s17, %s639_s18  ;;  %p645_p7 = scmp.lt.s32.totalorder %s639_s18, %s639_s18 }
  0x13   :  { %p646_p8 = por %p645_p7, %p644_p6 }
  0x15   :  { %p647_p9 = pnand %p646_p8, %p640_p5 }
  0x17   :  { %650 = shalt.err (!%p647_p9)
}
  0x18   :  { %s681_s19 = smov 128   ;;  %s682_s20 = smov 8  }
  0x19   :  { %33 = dma.hbm_to_vmem [thread:$0]  %s780_s1, 4096, %s28_s17, [#allocation8], %s681_s19, %s681_s19, %s682_s20  }
  0x1a   :  { %671 = dma.done.wait [#allocation5], 8192  }
  0x1b   :  { %672 = vsyncadd [#allocation5], 4294959104 }
  0x1c   :  { %673 = dma.done.wait [#allocation8], 4096  }
  0x1d   :  { %674 = vsyncadd [#allocation8], 4294963200  ;;  %v683_v0 = vmov 0.0   ;;  %v55_v1 = vld [vmem:[#allocation7 + $0x78] sm:$0xff]  ;;  %v54_v2 = vld [vmem:[#allocation7 + $0x70] sm:$0xff]  ;;  %s684_s0 = smov [#allocation9]  }
  0x1e   :  { %200 = vmatprep.subr.mxu0 %v683_v0  ;;  %539 = vmatprep.subr.mxu1 %v683_v0  ;;  %v53_v3 = vld [vmem:[#allocation7 + $0x68] sm:$0xff]  ;;  %v52_v4 = vld [vmem:[#allocation7 + $0x60] sm:$0xff]  ;;  %v51_v5 = vld [vmem:[#allocation7 + $0x58] sm:$0xff]  ;;  %s526_s1 = sshll.u32 %s684_s0, 4  ;;  %s527_s1 = int_to_ptr.vmem [resolvable:$true] %s526_s1 }
  0x1f   :  { %201 = vmatpush1.msra.mxu0 %v55_v1  ;;  %571 = vmatpush1.msra.mxu1 %v55_v1  ;;  %v50_v6 = vld [vmem:[#allocation7 + $0x50] sm:$0xff]  ;;  %v49_v7 = vld [vmem:[#allocation7 + $0x48] sm:$0xff]  ;;  %v48_v8 = vld [vmem:[#allocation7 + $0x40] sm:$0xff]  ;;  %s651_s23 = scalar_lea.vmem %s527_s1, 4096  ;;  %p656_p11 = scmp.lt.s32.totalorder %s527_s1, %s527_s1 }
  0x20   :  { %202 = vmatprep.subr.mxu0 %v683_v0  ;;  %540 = vmatprep.subr.mxu1 %v683_v0  ;;  %v47_v9 = vld [vmem:[#allocation7 + $0x38] sm:$0xff]  ;;  %v46_v10 = vld [vmem:[#allocation7 + $0x30] sm:$0xff]  ;;  %v45_v11 = vld [vmem:[#allocation7 + $0x28] sm:$0xff]  ;;  %p652_p10 = scmp.ne.s32.totalorder %s527_s1, %s651_s23  ;;  %p657_p12 = scmp.lt.s32.totalorder %s651_s23, %s651_s23 }
  0x21   :  { %203 = vmatpush1.msra.mxu0 %v54_v2  ;;  %572 = vmatpush1.msra.mxu1 %v54_v2  ;;  %v44_v12 = vld [vmem:[#allocation7 + $0x20] sm:$0xff]  ;;  %v43_v13 = vld [vmem:[#allocation7 + $0x18] sm:$0xff]  ;;  %v42_v14 = vld [vmem:[#allocation7 + $0x10] sm:$0xff] }
  0x22   :  { %204 = vmatprep.subr.mxu0 %v683_v0  ;;  %541 = vmatprep.subr.mxu1 %v683_v0  ;;  %v41_v15 = vld [vmem:[#allocation7 + $0x8] sm:$0xff]  ;;  %v40_v16 = vld [vmem:[#allocation7] sm:$0xff]  ;;  %v71_v17 = vld [vmem:[#allocation7 + $0xf8] sm:$0xff]  ;;  %p658_p13 = por %p657_p12, %p656_p11 }
  0x23   :  { %205 = vmatpush1.msra.mxu0 %v53_v3  ;;  %573 = vmatpush1.msra.mxu1 %v53_v3  ;;  %v70_v18 = vld [vmem:[#allocation7 + $0xf0] sm:$0xff]  ;;  %v69_v19 = vld [vmem:[#allocation7 + $0xe8] sm:$0xff]  ;;  %v68_v20 = vld [vmem:[#allocation7 + $0xe0] sm:$0xff] }
  0x24   :  { %206 = vmatprep.subr.mxu0 %v683_v0  ;;  %542 = vmatprep.subr.mxu1 %v683_v0  ;;  %v67_v21 = vld [vmem:[#allocation7 + $0xd8] sm:$0xff]  ;;  %v66_v22 = vld [vmem:[#allocation7 + $0xd0] sm:$0xff]  ;;  %v65_v23 = vld [vmem:[#allocation7 + $0xc8] sm:$0xff]  ;;  %p659_p0 = pnand %p658_p13, %p652_p10 }
  0x25   :  { %207 = vmatpush1.msra.mxu0 %v52_v4  ;;  %574 = vmatpush1.msra.mxu1 %v52_v4  ;;  %v64_v24 = vld [vmem:[#allocation7 + $0xc0] sm:$0xff]  ;;  %v63_v25 = vld [vmem:[#allocation7 + $0xb8] sm:$0xff]  ;;  %v62_v26 = vld [vmem:[#allocation7 + $0xb0] sm:$0xff] }
  0x26   :  { %208 = vmatprep.subr.mxu0 %v683_v0  ;;  %543 = vmatprep.subr.mxu1 %v683_v0  ;;  %v61_v27 = vld [vmem:[#allocation7 + $0xa8] sm:$0xff]  ;;  %v60_v28 = vld [vmem:[#allocation7 + $0xa0] sm:$0xff]  ;;  %v59_v29 = vld [vmem:[#allocation7 + $0x98] sm:$0xff] }
  0x27   :  { %209 = vmatpush1.msra.mxu0 %v51_v5  ;;  %575 = vmatpush1.msra.mxu1 %v51_v5  ;;  %v58_v30 = vld [vmem:[#allocation7 + $0x90] sm:$0xff]  ;;  %v57_v31 = vld [vmem:[#allocation7 + $0x88] sm:$0xff]  ;;  %v56_v32 = vld [vmem:[#allocation7 + $0x80] sm:$0xff] }
  0x28   :  { %210 = vmatprep.subr.mxu0 %v683_v0  ;;  %544 = vmatprep.subr.mxu1 %v683_v0  ;;  %v105_v33 = vld [vmem:[#allocation4 + $0x8] sm:$0xff]  ;;  %v104_v35 = vld [vmem:[#allocation4] sm:$0xff]  ;;  %v107_v37 = vld [vmem:[#allocation4 + $0x18] sm:$0xff] }
  0x29   :  { %211 = vmatpush1.msra.mxu0 %v50_v6  ;;  %576 = vmatpush1.msra.mxu1 %v50_v6  ;;  %v137_v34 = vld [vmem:[#allocation4 + $0x108] sm:$0xff]  ;;  %v136_v36 = vld [vmem:[#allocation4 + $0x100] sm:$0xff]  ;;  %v139_v38 = vld [vmem:[#allocation4 + $0x118] sm:$0xff] }
  0x2a   :  { %212 = vmatprep.subr.mxu0 %v683_v0  ;;  %545 = vmatprep.subr.mxu1 %v683_v0  ;;  %v106_v39 = vld [vmem:[#allocation4 + $0x10] sm:$0xff]  ;;  %v109_v41 = vld [vmem:[#allocation4 + $0x28] sm:$0xff]  ;;  %v108_v43 = vld [vmem:[#allocation4 + $0x20] sm:$0xff] }
  0x2b   :  { %213 = vmatpush1.msra.mxu0 %v49_v7  ;;  %577 = vmatpush1.msra.mxu1 %v49_v7  ;;  %v138_v40 = vld [vmem:[#allocation4 + $0x110] sm:$0xff]  ;;  %v141_v42 = vld [vmem:[#allocation4 + $0x128] sm:$0xff]  ;;  %v140_v44 = vld [vmem:[#allocation4 + $0x120] sm:$0xff] }
  0x2c   :  { %214 = vmatprep.subr.mxu0 %v683_v0  ;;  %546 = vmatprep.subr.mxu1 %v683_v0  ;;  %v111_v45 = vld [vmem:[#allocation4 + $0x38] sm:$0xff]  ;;  %v110_v47 = vld [vmem:[#allocation4 + $0x30] sm:$0xff]  ;;  %v113_v49 = vld [vmem:[#allocation4 + $0x48] sm:$0xff] }
  0x2d   :  { %215 = vmatpush1.msra.mxu0 %v48_v8  ;;  %578 = vmatpush1.msra.mxu1 %v48_v8  ;;  %v143_v46 = vld [vmem:[#allocation4 + $0x138] sm:$0xff]  ;;  %v142_v48 = vld [vmem:[#allocation4 + $0x130] sm:$0xff]  ;;  %v145_v50 = vld [vmem:[#allocation4 + $0x148] sm:$0xff] }
  0x2e   :  { %216 = vmatprep.subr.mxu0 %v683_v0  ;;  %547 = vmatprep.subr.mxu1 %v683_v0  ;;  %v112_v51 = vld [vmem:[#allocation4 + $0x40] sm:$0xff]  ;;  %v115_v53 = vld [vmem:[#allocation4 + $0x58] sm:$0xff]  ;;  %v114_v55 = vld [vmem:[#allocation4 + $0x50] sm:$0xff] }
  0x2f   :  { %217 = vmatpush1.msra.mxu0 %v47_v9  ;;  %579 = vmatpush1.msra.mxu1 %v47_v9  ;;  %v144_v52 = vld [vmem:[#allocation4 + $0x140] sm:$0xff]  ;;  %v147_v54 = vld [vmem:[#allocation4 + $0x158] sm:$0xff]  ;;  %v146_v56 = vld [vmem:[#allocation4 + $0x150] sm:$0xff] }
  0x30   :  { %218 = vmatprep.subr.mxu0 %v683_v0  ;;  %548 = vmatprep.subr.mxu1 %v683_v0  ;;  %v117_v57 = vld [vmem:[#allocation4 + $0x68] sm:$0xff]  ;;  %v116_v59 = vld [vmem:[#allocation4 + $0x60] sm:$0xff]  ;;  %v119_v61 = vld [vmem:[#allocation4 + $0x78] sm:$0xff] }
  0x31   :  { %219 = vmatpush1.msra.mxu0 %v46_v10  ;;  %580 = vmatpush1.msra.mxu1 %v46_v10  ;;  %v149_v58 = vld [vmem:[#allocation4 + $0x168] sm:$0xff]  ;;  %v148_v60 = vld [vmem:[#allocation4 + $0x160] sm:$0xff]  ;;  %v151_v62 = vld [vmem:[#allocation4 + $0x178] sm:$0xff] }
  0x32   :  { %220 = vmatprep.subr.mxu0 %v683_v0  ;;  %549 = vmatprep.subr.mxu1 %v683_v0  ;;  %v118_v63 = vld [vmem:[#allocation4 + $0x70] sm:$0xff]  ;;  %v121_v1 = vld [vmem:[#allocation4 + $0x88] sm:$0xff]  ;;  %v120_v3 = vld [vmem:[#allocation4 + $0x80] sm:$0xff] }
  0x33   :  { %221 = vmatpush1.msra.mxu0 %v45_v11  ;;  %581 = vmatpush1.msra.mxu1 %v45_v11  ;;  %v153_v2 = vld [vmem:[#allocation4 + $0x188] sm:$0xff]  ;;  %v152_v4 = vld [vmem:[#allocation4 + $0x180] sm:$0xff]  ;;  %v123_v5 = vld [vmem:[#allocation4 + $0x98] sm:$0xff] }
  0x34   :  { %222 = vmatprep.subr.mxu0 %v683_v0  ;;  %550 = vmatprep.subr.mxu1 %v683_v0  ;;  %v155_v6 = vld [vmem:[#allocation4 + $0x198] sm:$0xff]  ;;  %v122_v7 = vld [vmem:[#allocation4 + $0x90] sm:$0xff]  ;;  %v125_v9 = vld [vmem:[#allocation4 + $0xa8] sm:$0xff] }
  0x35   :  { %223 = vmatpush1.msra.mxu0 %v44_v12  ;;  %582 = vmatpush1.msra.mxu1 %v44_v12  ;;  %v154_v8 = vld [vmem:[#allocation4 + $0x190] sm:$0xff]  ;;  %v157_v10 = vld [vmem:[#allocation4 + $0x1a8] sm:$0xff]  ;;  %v124_v11 = vld [vmem:[#allocation4 + $0xa0] sm:$0xff] }
  0x36   :  { %224 = vmatprep.subr.mxu0 %v683_v0  ;;  %551 = vmatprep.subr.mxu1 %v683_v0  ;;  %v156_v12 = vld [vmem:[#allocation4 + $0x1a0] sm:$0xff] }
  0x37   :  { %225 = vmatpush1.msra.mxu0 %v43_v13  ;;  %583 = vmatpush1.msra.mxu1 %v43_v13  ;;  %v127_v13 = vld [vmem:[#allocation4 + $0xb8] sm:$0xff] }
  0x38   :  { %226 = vmatprep.subr.mxu0 %v683_v0  ;;  %552 = vmatprep.subr.mxu1 %v683_v0 }
  0x39   :  { %227 = vmatpush1.msra.mxu0 %v42_v14  ;;  %584 = vmatpush1.msra.mxu1 %v42_v14  ;;  %v159_v14 = vld [vmem:[#allocation4 + $0x1b8] sm:$0xff] }
  0x3a   :  { %228 = vmatprep.subr.mxu0 %v683_v0  ;;  %553 = vmatprep.subr.mxu1 %v683_v0 }
  0x3b   :  { %229 = vmatpush1.msra.mxu0 %v41_v15  ;;  %585 = vmatpush1.msra.mxu1 %v41_v15  ;;  %v126_v15 = vld [vmem:[#allocation4 + $0xb0] sm:$0xff] }
  0x3c   :  { %230 = vmatprep.subr.mxu0 %v683_v0  ;;  %554 = vmatprep.subr.mxu1 %v683_v0 }
  0x3d   :  { %231 = vmatpush1.msra.mxu0 %v40_v16  ;;  %586 = vmatpush1.msra.mxu1 %v40_v16  ;;  %v158_v16 = vld [vmem:[#allocation4 + $0x1b0] sm:$0xff] }
  0x3e   :  { %232 = vmatprep.subr.mxu0 %v683_v0  ;;  %555 = vmatprep.subr.mxu1 %v683_v0 }
  0x3f   :  { %233 = vmatpush2.msra.mxu0 %v71_v17  ;;  %587 = vmatpush2.msra.mxu1 %v71_v17  ;;  %v129_v17 = vld [vmem:[#allocation4 + $0xc8] sm:$0xff] }
  0x40   :  { %234 = vmatprep.subr.mxu0 %v683_v0  ;;  %556 = vmatprep.subr.mxu1 %v683_v0 }
  0x41   :  { %235 = vmatpush2.msra.mxu0 %v70_v18  ;;  %588 = vmatpush2.msra.mxu1 %v70_v18  ;;  %v161_v18 = vld [vmem:[#allocation4 + $0x1c8] sm:$0xff] }
  0x42   :  { %236 = vmatprep.subr.mxu0 %v683_v0  ;;  %557 = vmatprep.subr.mxu1 %v683_v0 }
  0x43   :  { %237 = vmatpush2.msra.mxu0 %v69_v19  ;;  %589 = vmatpush2.msra.mxu1 %v69_v19  ;;  %v128_v19 = vld [vmem:[#allocation4 + $0xc0] sm:$0xff] }
  0x44   :  { %238 = vmatprep.subr.mxu0 %v683_v0  ;;  %558 = vmatprep.subr.mxu1 %v683_v0 }
  0x45   :  { %239 = vmatpush2.msra.mxu0 %v68_v20  ;;  %590 = vmatpush2.msra.mxu1 %v68_v20  ;;  %v160_v20 = vld [vmem:[#allocation4 + $0x1c0] sm:$0xff] }
  0x46   :  { %240 = vmatprep.subr.mxu0 %v683_v0  ;;  %559 = vmatprep.subr.mxu1 %v683_v0 }
  0x47   :  { %241 = vmatpush2.msra.mxu0 %v67_v21  ;;  %591 = vmatpush2.msra.mxu1 %v67_v21  ;;  %v131_v21 = vld [vmem:[#allocation4 + $0xd8] sm:$0xff] }
  0x48   :  { %242 = vmatprep.subr.mxu0 %v683_v0  ;;  %560 = vmatprep.subr.mxu1 %v683_v0 }
  0x49   :  { %243 = vmatpush2.msra.mxu0 %v66_v22  ;;  %592 = vmatpush2.msra.mxu1 %v66_v22  ;;  %v163_v22 = vld [vmem:[#allocation4 + $0x1d8] sm:$0xff] }
  0x4a   :  { %244 = vmatprep.subr.mxu0 %v683_v0  ;;  %561 = vmatprep.subr.mxu1 %v683_v0 }
  0x4b   :  { %245 = vmatpush2.msra.mxu0 %v65_v23  ;;  %593 = vmatpush2.msra.mxu1 %v65_v23  ;;  %v130_v23 = vld [vmem:[#allocation4 + $0xd0] sm:$0xff] }
  0x4c   :  { %246 = vmatprep.subr.mxu0 %v683_v0  ;;  %562 = vmatprep.subr.mxu1 %v683_v0 }
  0x4d   :  { %247 = vmatpush2.msra.mxu0 %v64_v24  ;;  %594 = vmatpush2.msra.mxu1 %v64_v24  ;;  %v162_v24 = vld [vmem:[#allocation4 + $0x1d0] sm:$0xff] }
  0x4e   :  { %248 = vmatprep.subr.mxu0 %v683_v0  ;;  %563 = vmatprep.subr.mxu1 %v683_v0 }
  0x4f   :  { %249 = vmatpush2.msra.mxu0 %v63_v25  ;;  %595 = vmatpush2.msra.mxu1 %v63_v25  ;;  %v133_v25 = vld [vmem:[#allocation4 + $0xe8] sm:$0xff] }
  0x50   :  { %250 = vmatprep.subr.mxu0 %v683_v0  ;;  %564 = vmatprep.subr.mxu1 %v683_v0 }
  0x51   :  { %251 = vmatpush2.msra.mxu0 %v62_v26  ;;  %596 = vmatpush2.msra.mxu1 %v62_v26  ;;  %v165_v26 = vld [vmem:[#allocation4 + $0x1e8] sm:$0xff] }
  0x52   :  { %252 = vmatprep.subr.mxu0 %v683_v0  ;;  %565 = vmatprep.subr.mxu1 %v683_v0 }
  0x53   :  { %253 = vmatpush2.msra.mxu0 %v61_v27  ;;  %597 = vmatpush2.msra.mxu1 %v61_v27  ;;  %v132_v27 = vld [vmem:[#allocation4 + $0xe0] sm:$0xff] }
  0x54   :  { %254 = vmatprep.subr.mxu0 %v683_v0  ;;  %566 = vmatprep.subr.mxu1 %v683_v0 }
  0x55   :  { %255 = vmatpush2.msra.mxu0 %v60_v28  ;;  %598 = vmatpush2.msra.mxu1 %v60_v28  ;;  %v164_v28 = vld [vmem:[#allocation4 + $0x1e0] sm:$0xff] }
  0x56   :  { %256 = vmatprep.subr.mxu0 %v683_v0  ;;  %567 = vmatprep.subr.mxu1 %v683_v0 }
  0x57   :  { %257 = vmatpush2.msra.mxu0 %v59_v29  ;;  %599 = vmatpush2.msra.mxu1 %v59_v29  ;;  %v135_v29 = vld [vmem:[#allocation4 + $0xf8] sm:$0xff] }
  0x58   :  { %258 = vmatprep.subr.mxu0 %v683_v0  ;;  %568 = vmatprep.subr.mxu1 %v683_v0 }
  0x59   :  { %259 = vmatpush2.msra.mxu0 %v58_v30  ;;  %600 = vmatpush2.msra.mxu1 %v58_v30  ;;  %v167_v30 = vld [vmem:[#allocation4 + $0x1f8] sm:$0xff] }
  0x5a   :  { %260 = vmatprep.subr.mxu0 %v683_v0  ;;  %569 = vmatprep.subr.mxu1 %v683_v0 }
  0x5b   :  { %261 = vmatpush2.msra.mxu0 %v57_v31  ;;  %601 = vmatpush2.msra.mxu1 %v57_v31  ;;  %v134_v31 = vld [vmem:[#allocation4 + $0xf0] sm:$0xff] }
  0x5c   :  { %262 = vmatprep.subr.mxu0 %v683_v0  ;;  %570 = vmatprep.subr.mxu1 %v683_v0  ;;  %v150_v0 = vld [vmem:[#allocation4 + $0x170] sm:$0xff] }
  0x5d   :  { %263 = vmatpush2.msra.mxu0 %v56_v32  ;;  %602 = vmatpush2.msra.mxu1 %v56_v32  ;;  %v166_v32 = vld [vmem:[#allocation4 + $0x1f0] sm:$0xff] }
  0x5e   :  { %264 = vmatprep.mubr.f32.mxu0 %v105_v33  ;;  %344 = vmatprep.mubr.f32.mxu1 %v137_v34 }
  0x5f   :  { %265 = vmatmul.mubr.f32.vlgmr.msra.gmra.mxu0 %v104_v35  ;;  %345 = vmatmul.mubr.f32.vlgmr.msra.gmra.mxu1 %v136_v36 }
  0x60   :  { %269 = vmatprep.mubr.f32.mxu0 %v107_v37  ;;  %349 = vmatprep.mubr.f32.mxu1 %v139_v38 }
  0x63   :  { %270 = vmatmul.mubr.f32.gmra.mxu0 %v106_v39  ;;  %350 = vmatmul.mubr.f32.gmra.mxu1 %v138_v40 }
  0x64   :  { %274 = vmatprep.mubr.f32.mxu0 %v109_v41  ;;  %354 = vmatprep.mubr.f32.mxu1 %v141_v42 }
  0x67   :  { %275 = vmatmul.mubr.f32.gmra.mxu0 %v108_v43  ;;  %355 = vmatmul.mubr.f32.gmra.mxu1 %v140_v44 }
  0x68   :  { %279 = vmatprep.mubr.f32.mxu0 %v111_v45  ;;  %359 = vmatprep.mubr.f32.mxu1 %v143_v46 }
  0x6b   :  { %280 = vmatmul.mubr.f32.gmra.mxu0 %v110_v47  ;;  %360 = vmatmul.mubr.f32.gmra.mxu1 %v142_v48 }
  0x6c   :  { %284 = vmatprep.mubr.f32.mxu0 %v113_v49  ;;  %364 = vmatprep.mubr.f32.mxu1 %v145_v50 }
  0x6f   :  { %285 = vmatmul.mubr.f32.gmra.mxu0 %v112_v51  ;;  %365 = vmatmul.mubr.f32.gmra.mxu1 %v144_v52 }
  0x70   :  { %289 = vmatprep.mubr.f32.mxu0 %v115_v53  ;;  %369 = vmatprep.mubr.f32.mxu1 %v147_v54 }
  0x73   :  { %290 = vmatmul.mubr.f32.gmra.mxu0 %v114_v55  ;;  %370 = vmatmul.mubr.f32.gmra.mxu1 %v146_v56 }
  0x74   :  { %294 = vmatprep.mubr.f32.mxu0 %v117_v57  ;;  %374 = vmatprep.mubr.f32.mxu1 %v149_v58 }
  0x77   :  { %295 = vmatmul.mubr.f32.gmra.mxu0 %v116_v59  ;;  %375 = vmatmul.mubr.f32.gmra.mxu1 %v148_v60 }
  0x78   :  { %299 = vmatprep.mubr.f32.mxu0 %v119_v61  ;;  %379 = vmatprep.mubr.f32.mxu1 %v151_v62 }
  0x7b   :  { %300 = vmatmul.mubr.f32.gmra.mxu0 %v118_v63  ;;  %380 = vmatmul.mubr.f32.gmra.mxu1 %v150_v0 }
  0x7c   :  { %304 = vmatprep.mubr.f32.mxu0 %v121_v1  ;;  %384 = vmatprep.mubr.f32.mxu1 %v153_v2 }
  0x7f   :  { %305 = vmatmul.mubr.f32.gmra.mxu0 %v120_v3  ;;  %385 = vmatmul.mubr.f32.gmra.mxu1 %v152_v4 }
  0x80   :  { %309 = vmatprep.mubr.f32.mxu0 %v123_v5  ;;  %389 = vmatprep.mubr.f32.mxu1 %v155_v6 }
  0x83   :  { %310 = vmatmul.mubr.f32.gmra.mxu0 %v122_v7  ;;  %390 = vmatmul.mubr.f32.gmra.mxu1 %v154_v8 }
  0x84   :  { %314 = vmatprep.mubr.f32.mxu0 %v125_v9  ;;  %394 = vmatprep.mubr.f32.mxu1 %v157_v10 }
  0x87   :  { %315 = vmatmul.mubr.f32.gmra.mxu0 %v124_v11  ;;  %395 = vmatmul.mubr.f32.gmra.mxu1 %v156_v12 }
  0x88   :  { %319 = vmatprep.mubr.f32.mxu0 %v127_v13  ;;  %399 = vmatprep.mubr.f32.mxu1 %v159_v14 }
  0x8b   :  { %320 = vmatmul.mubr.f32.gmra.mxu0 %v126_v15  ;;  %400 = vmatmul.mubr.f32.gmra.mxu1 %v158_v16 }
  0x8c   :  { %324 = vmatprep.mubr.f32.mxu0 %v129_v17  ;;  %404 = vmatprep.mubr.f32.mxu1 %v161_v18 }
  0x8f   :  { %325 = vmatmul.mubr.f32.gmra.mxu0 %v128_v19  ;;  %405 = vmatmul.mubr.f32.gmra.mxu1 %v160_v20 }
  0x90   :  { %329 = vmatprep.mubr.f32.mxu0 %v131_v21  ;;  %409 = vmatprep.mubr.f32.mxu1 %v163_v22 }
  0x93   :  { %330 = vmatmul.mubr.f32.gmra.mxu0 %v130_v23  ;;  %410 = vmatmul.mubr.f32.gmra.mxu1 %v162_v24 }
  0x94   :  { %334 = vmatprep.mubr.f32.mxu0 %v133_v25  ;;  %414 = vmatprep.mubr.f32.mxu1 %v165_v26 }
  0x97   :  { %335 = vmatmul.mubr.f32.gmra.mxu0 %v132_v27  ;;  %415 = vmatmul.mubr.f32.gmra.mxu1 %v164_v28 }
  0x98   :  { %339 = vmatprep.mubr.f32.mxu0 %v135_v29  ;;  %419 = vmatprep.mubr.f32.mxu1 %v167_v30 }
  0x9b   :  { %340 = vmatmul.mubr.f32.gmra.mxu0 %v134_v31  ;;  %420 = vmatmul.mubr.f32.gmra.mxu1 %v166_v32 }
 0x11f   :  { %v266_v33 = vpop.f32.mrf.mxu0  ;;  %v346_v34 = vpop.f32.mrf.mxu1 }
 0x120   :  { %489 = vst [vmem:[#allocation9] sm:$0xff] %v266_v33  ;;  %505 = vst [vmem:[#allocation9 + $0x80] sm:$0xff] %v346_v34 }
 0x121   :  { %v268_v35 = vpop.f32.mrf.mxu0  ;;  %v348_v36 = vpop.f32.mrf.mxu1 }
 0x123   :  { %v271_v37 = vpop.f32.mrf.mxu0  ;;  %v351_v38 = vpop.f32.mrf.mxu1 }
 0x124   :  { %490 = vst [vmem:[#allocation9 + $0x8] sm:$0xff] %v271_v37  ;;  %506 = vst [vmem:[#allocation9 + $0x88] sm:$0xff] %v351_v38 }
 0x125   :  { %v273_v39 = vpop.f32.mrf.mxu0  ;;  %v353_v40 = vpop.f32.mrf.mxu1 }
 0x127   :  { %v276_v41 = vpop.f32.mrf.mxu0  ;;  %v356_v42 = vpop.f32.mrf.mxu1 }
 0x128   :  { %491 = vst [vmem:[#allocation9 + $0x10] sm:$0xff] %v276_v41  ;;  %507 = vst [vmem:[#allocation9 + $0x90] sm:$0xff] %v356_v42 }
 0x129   :  { %v278_v43 = vpop.f32.mrf.mxu0  ;;  %v358_v44 = vpop.f32.mrf.mxu1 }
 0x12b   :  { %v281_v45 = vpop.f32.mrf.mxu0  ;;  %v361_v46 = vpop.f32.mrf.mxu1 }
 0x12c   :  { %492 = vst [vmem:[#allocation9 + $0x18] sm:$0xff] %v281_v45  ;;  %508 = vst [vmem:[#allocation9 + $0x98] sm:$0xff] %v361_v46 }
 0x12d   :  { %v283_v47 = vpop.f32.mrf.mxu0  ;;  %v363_v48 = vpop.f32.mrf.mxu1 }
 0x12f   :  { %v286_v49 = vpop.f32.mrf.mxu0  ;;  %v366_v50 = vpop.f32.mrf.mxu1 }
 0x130   :  { %493 = vst [vmem:[#allocation9 + $0x20] sm:$0xff] %v286_v49  ;;  %509 = vst [vmem:[#allocation9 + $0xa0] sm:$0xff] %v366_v50 }
 0x131   :  { %v288_v51 = vpop.f32.mrf.mxu0  ;;  %v368_v52 = vpop.f32.mrf.mxu1 }
 0x133   :  { %v291_v53 = vpop.f32.mrf.mxu0  ;;  %v371_v54 = vpop.f32.mrf.mxu1 }
 0x134   :  { %494 = vst [vmem:[#allocation9 + $0x28] sm:$0xff] %v291_v53  ;;  %510 = vst [vmem:[#allocation9 + $0xa8] sm:$0xff] %v371_v54 }
 0x135   :  { %v293_v55 = vpop.f32.mrf.mxu0  ;;  %v373_v56 = vpop.f32.mrf.mxu1 }
 0x137   :  { %v296_v57 = vpop.f32.mrf.mxu0  ;;  %v376_v58 = vpop.f32.mrf.mxu1 }
 0x138   :  { %495 = vst [vmem:[#allocation9 + $0x30] sm:$0xff] %v296_v57  ;;  %511 = vst [vmem:[#allocation9 + $0xb0] sm:$0xff] %v376_v58 }
 0x139   :  { %v298_v59 = vpop.f32.mrf.mxu0  ;;  %v378_v60 = vpop.f32.mrf.mxu1 }
 0x13b   :  { %v301_v61 = vpop.f32.mrf.mxu0  ;;  %v381_v62 = vpop.f32.mrf.mxu1 }
 0x13c   :  { %496 = vst [vmem:[#allocation9 + $0x38] sm:$0xff] %v301_v61  ;;  %512 = vst [vmem:[#allocation9 + $0xb8] sm:$0xff] %v381_v62 }
 0x13d   :  { %v303_v63 = vpop.f32.mrf.mxu0  ;;  %v383_v0 = vpop.f32.mrf.mxu1 }
 0x13f   :  { %v306_v1 = vpop.f32.mrf.mxu0  ;;  %v386_v2 = vpop.f32.mrf.mxu1 }
 0x140   :  { %497 = vst [vmem:[#allocation9 + $0x40] sm:$0xff] %v306_v1  ;;  %513 = vst [vmem:[#allocation9 + $0xc0] sm:$0xff] %v386_v2 }
 0x141   :  { %v308_v3 = vpop.f32.mrf.mxu0  ;;  %v388_v4 = vpop.f32.mrf.mxu1 }
 0x143   :  { %v311_v5 = vpop.f32.mrf.mxu0  ;;  %v391_v6 = vpop.f32.mrf.mxu1 }
 0x144   :  { %498 = vst [vmem:[#allocation9 + $0x48] sm:$0xff] %v311_v5  ;;  %514 = vst [vmem:[#allocation9 + $0xc8] sm:$0xff] %v391_v6 }
 0x145   :  { %v313_v7 = vpop.f32.mrf.mxu0  ;;  %v393_v8 = vpop.f32.mrf.mxu1 }
 0x147   :  { %v316_v9 = vpop.f32.mrf.mxu0  ;;  %v396_v10 = vpop.f32.mrf.mxu1 }
 0x148   :  { %499 = vst [vmem:[#allocation9 + $0x50] sm:$0xff] %v316_v9  ;;  %515 = vst [vmem:[#allocation9 + $0xd0] sm:$0xff] %v396_v10 }
 0x149   :  { %v318_v11 = vpop.f32.mrf.mxu0  ;;  %v398_v12 = vpop.f32.mrf.mxu1 }
 0x14b   :  { %v321_v13 = vpop.f32.mrf.mxu0  ;;  %v401_v14 = vpop.f32.mrf.mxu1 }
 0x14c   :  { %500 = vst [vmem:[#allocation9 + $0x58] sm:$0xff] %v321_v13  ;;  %516 = vst [vmem:[#allocation9 + $0xd8] sm:$0xff] %v401_v14 }
 0x14d   :  { %v323_v15 = vpop.f32.mrf.mxu0  ;;  %v403_v16 = vpop.f32.mrf.mxu1 }
 0x14f   :  { %v326_v17 = vpop.f32.mrf.mxu0  ;;  %v406_v18 = vpop.f32.mrf.mxu1 }
 0x150   :  { %501 = vst [vmem:[#allocation9 + $0x60] sm:$0xff] %v326_v17  ;;  %517 = vst [vmem:[#allocation9 + $0xe0] sm:$0xff] %v406_v18 }
 0x151   :  { %v328_v19 = vpop.f32.mrf.mxu0  ;;  %v408_v20 = vpop.f32.mrf.mxu1 }
 0x153   :  { %v331_v21 = vpop.f32.mrf.mxu0  ;;  %v411_v22 = vpop.f32.mrf.mxu1 }
 0x154   :  { %502 = vst [vmem:[#allocation9 + $0x68] sm:$0xff] %v331_v21  ;;  %518 = vst [vmem:[#allocation9 + $0xe8] sm:$0xff] %v411_v22 }
 0x155   :  { %v333_v23 = vpop.f32.mrf.mxu0  ;;  %v413_v24 = vpop.f32.mrf.mxu1 }
 0x157   :  { %v336_v25 = vpop.f32.mrf.mxu0  ;;  %v416_v26 = vpop.f32.mrf.mxu1 }
 0x158   :  { %503 = vst [vmem:[#allocation9 + $0x70] sm:$0xff] %v336_v25  ;;  %519 = vst [vmem:[#allocation9 + $0xf0] sm:$0xff] %v416_v26 }
 0x159   :  { %v338_v27 = vpop.f32.mrf.mxu0  ;;  %v418_v28 = vpop.f32.mrf.mxu1 }
 0x15b   :  { %v341_v29 = vpop.f32.mrf.mxu0  ;;  %v421_v30 = vpop.f32.mrf.mxu1 }
 0x15c   :  { %504 = vst [vmem:[#allocation9 + $0x78] sm:$0xff] %v341_v29  ;;  %520 = vst [vmem:[#allocation9 + $0xf8] sm:$0xff] %v421_v30 }
 0x15d   :  { %v343_v31 = vpop.f32.mrf.mxu0  ;;  %v423_v32 = vpop.f32.mrf.mxu1 }
 0x15e   :  { %662 = shalt.err (!%p659_p0)
}
 0x15f   :  { %532 = dma.vmem_to_hbm [thread:$0]  %s527_s1, 4096, %s781_s2, [#allocation6], %s681_s19, %s681_s19, %s682_s20  }
 0x160   :  { %675 = dma.done.wait [#allocation6], 4096  }
 0x161   :  { %676 = vsyncadd [#allocation6], 4294963200 }
 0x162   :  { %536 = vsyncpa [#allocation5], 1 }
 0x163   :  { %537 = vsyncpa [#allocation8], 1 }
 0x164   :  { %538 = vsyncpa [#allocation6], 1 }

</bundles_post_ra>
